<compile_context>
chip_gen: v5e
topology: v5e:2x2
jax: 0.10.0
libtpu: 0.0.40
codegen_flags: <defaults>
</compile_context>

<pallas_src>
import math

import jax
import jax.numpy as jnp
from jax.experimental import pallas as pl
from jax.experimental.pallas import tpu as pltpu

# "Module parameters" from Softplusmax.__init__(dim, beta, threshold).
BETA = 1.0
THRESHOLD = 20.0

LANES = 128
TARGET_TILE_BYTES = 2 * 1024 * 1024     # ~2 MiB f32 working set per tile
MIN_GRID_TILES = 8                      # let v7x split the parallel axis across 2 TCs
VMEM_LIMIT_BYTES = 32 * 1024 * 1024     # safe on v5e/v6e (128 MiB) and v7x (64 MiB)


# ----------------------------------------------------------------------------
# shared math
# ----------------------------------------------------------------------------
def _sublane_align(dtype):
    """Minimum second-to-last tile dim: 8 (f32), 16 (bf16), 32 (8-bit)."""
    return max(8, 32 // jnp.dtype(dtype).itemsize)


def _softplus_f32(x):
    """PyTorch nn.Softplus(beta=BETA, threshold=THRESHOLD), f32 in / f32 out."""
    bx = x if BETA == 1.0 else BETA * x              # trace-time beta specialization
    sp = jnp.log1p(jnp.exp(jnp.minimum(bx, THRESHOLD)))
    if BETA != 1.0:
        sp = sp * (1.0 / BETA)
    # Above the threshold PyTorch reverts to the identity.
    return jnp.where(bx > THRESHOLD, x, sp)


# ----------------------------------------------------------------------------
# kernels
# ----------------------------------------------------------------------------
def _lane_kernel(x_ref, o_ref):
    """Normalize along the last (lane) axis of a (tn, C) tile."""
    sp = _softplus_f32(x_ref[...].astype(jnp.float32))
    # One exact reciprocal per row (denom is (tn, 1)) instead of tn*C divides.
    # NOTE: if a whole row underflows to 0, denom == 0 -> inf/nan, matching the
    # PyTorch reference (it also divides by zero).
    inv = 1.0 / jnp.sum(sp, axis=-1, keepdims=True)
    o_ref[...] = (sp * inv).astype(o_ref.dtype)


def _sublane_kernel(x_ref, o_ref):
    """Normalize along the sublane axis (-2) of a (bt, R, ct) tile (no transpose)."""
    sp = _softplus_f32(x_ref[...].astype(jnp.float32))
    inv = 1.0 / jnp.sum(sp, axis=-2, keepdims=True)       # (bt, 1, ct) reciprocals
    o_ref[...] = (sp * inv).astype(o_ref.dtype)


def _global_pass1_kernel(x_ref, sp_ref, psum_ref):
    """dim=None pass 1: softplus + per-tile partial sums (lane-kept)."""
    sp = _softplus_f32(x_ref[...].astype(jnp.float32))
    sp_ref[...] = sp
    psum_ref[...] = jnp.sum(sp, axis=0)[None, None, :]     # (1, 1, LANES)


def _global_pass2_kernel(inv_ref, sp_ref, o_ref):
    """dim=None pass 2: scale by the global reciprocal (SMEM scalar)."""
    o_ref[...] = (sp_ref[...] * inv_ref[0, 0]).astype(o_ref.dtype)


# ----------------------------------------------------------------------------
# tiling helpers
# ----------------------------------------------------------------------------
def _pick_row_tile(n, row_bytes, align):
    """Rows per tile: byte-budgeted, sublane-aligned, >= MIN_GRID_TILES tiles when n allows."""
    tn = max(align, (TARGET_TILE_BYTES // max(row_bytes, 1)) // align * align)
    if n >= MIN_GRID_TILES * align:
        tn = min(tn, max(align, (n // MIN_GRID_TILES) // align * align))
    if tn >= n:
        return n          # one full block (block dim == array dim is always legal)
    return tn


# ----------------------------------------------------------------------------
# wrappers
# ----------------------------------------------------------------------------
def _softplusmax_lanes(x2d):
    """dim == last: (N, C), reduce along lanes."""
    n, c = x2d.shape
    tn = _pick_row_tile(n, 4 * c, _sublane_align(x2d.dtype))
    # TODO(synk): for extremely wide rows (4*C >> TARGET_TILE_BYTES) even one aligned
    # row tile exceeds the VMEM budget; a two-pass lane-split reduction would be needed.
    return pl.pallas_call(
        _lane_kernel,
        out_shape=jax.ShapeDtypeStruct((n, c), x2d.dtype),
        grid=(pl.cdiv(n, tn),),
        in_specs=[pl.BlockSpec((tn, c), lambda i: (i, 0))],
        out_specs=pl.BlockSpec((tn, c), lambda i: (i, 0)),
        compiler_params=pltpu.CompilerParams(
            dimension_semantics=("parallel",),
            vmem_limit_bytes=VMEM_LIMIT_BYTES),
    )(x2d)


def _softplusmax_sublanes(x3d):
    """dim != last: (B, R, C) with reduction over R (sublane axis), original layout."""
    B, R, C = x3d.shape
    slab_bytes = 4 * R * C
    if slab_bytes > TARGET_TILE_BYTES and C % LANES == 0:
        bt = 1
        ct = min(C, max(LANES, (TARGET_TILE_BYTES // (4 * R)) // LANES * LANES))
    else:
        ct = C
        bt = max(1, min(B, TARGET_TILE_BYTES // max(slab_bytes, 1)))
        if B > 1:                                   # keep >= ~MIN_GRID_TILES grid steps
            bt = min(bt, max(1, pl.cdiv(B, MIN_GRID_TILES)))
    # TODO(synk): if a single (1, R, 128) slab still exceeds the VMEM budget (huge R),
    # a cross-tile accumulator over R would be required.
    return pl.pallas_call(
        _sublane_kernel,
        out_shape=jax.ShapeDtypeStruct((B, R, C), x3d.dtype),
        grid=(pl.cdiv(B, bt), pl.cdiv(C, ct)),
        in_specs=[pl.BlockSpec((bt, R, ct), lambda b, j: (b, 0, j))],
        out_specs=pl.BlockSpec((bt, R, ct), lambda b, j: (b, 0, j)),
        compiler_params=pltpu.CompilerParams(
            dimension_semantics=("parallel", "parallel"),
            vmem_limit_bytes=VMEM_LIMIT_BYTES),
    )(x3d)


def _softplusmax_global(x):
    """dim == None: normalize over all elements, tiled two-pass."""
    shape, dtype = x.shape, x.dtype
    s = x.size
    rows = pl.cdiv(s, LANES)
    tn = _pick_row_tile(rows, 4 * LANES, _sublane_align(jnp.float32))
    rows_p = pl.cdiv(rows, tn) * tn
    num_tiles = rows_p // tn

    flat = x.reshape(-1)
    pad = rows_p * LANES - s
    if pad:
        # Pad with a huge negative value -> softplus == 0, contributes nothing to the sum.
        flat = jnp.concatenate([flat, jnp.full((pad,), -1e30, dtype=dtype)])
    x2 = flat.reshape(rows_p, LANES)

    sp, partials = pl.pallas_call(
        _global_pass1_kernel,
        out_shape=(jax.ShapeDtypeStruct((rows_p, LANES), jnp.float32),
                   jax.ShapeDtypeStruct((num_tiles, 1, LANES), jnp.float32)),
        grid=(num_tiles,),
        in_specs=[pl.BlockSpec((tn, LANES), lambda i: (i, 0))],
        out_specs=(pl.BlockSpec((tn, LANES), lambda i: (i, 0)),
                   pl.BlockSpec((1, 1, LANES), lambda i: (i, 0, 0))),
        compiler_params=pltpu.CompilerParams(
            dimension_semantics=("parallel",),
            vmem_limit_bytes=VMEM_LIMIT_BYTES),
    )(x2)

    inv = (1.0 / jnp.sum(partials)).reshape(1, 1).astype(jnp.float32)

    out = pl.pallas_call(
        _global_pass2_kernel,
        out_shape=jax.ShapeDtypeStruct((rows_p, LANES), dtype),
        grid=(num_tiles,),
        in_specs=[pl.BlockSpec(memory_space=pltpu.MemorySpace.SMEM),
                  pl.BlockSpec((tn, LANES), lambda i: (i, 0))],
        out_specs=pl.BlockSpec((tn, LANES), lambda i: (i, 0)),
        compiler_params=pltpu.CompilerParams(
            dimension_semantics=("parallel",),
            vmem_limit_bytes=VMEM_LIMIT_BYTES),
    )(inv, sp)

    return out.reshape(-1)[:s].reshape(shape)


def softplusmax(x, dim=None):
    """Pallas implementation of Softplusmax.forward (dim=None matches the PyTorch default)."""
    if dim is None:
        return _softplusmax_global(x)
    dim = dim % x.ndim
    if dim == x.ndim - 1:
        lead, c = x.shape[:-1], x.shape[-1]
        n = math.prod(lead) if lead else 1
        return _softplusmax_lanes(x.reshape(n, c)).reshape(x.shape)
    # Non-last dim: pure reshape (no transpose) to (B, R, C); reduce along R (sublanes).
    b = math.prod(x.shape[:dim]) if dim > 0 else 1
    r = x.shape[dim]
    c = math.prod(x.shape[dim + 1:])
    return _softplusmax_sublanes(x.reshape(b, r, c)).reshape(x.shape)


# ----------------------------------------------------------------------------
# pure-JAX reference + test
# ----------------------------------------------------------------------------
def _reference(x, dim):
    bx = x if BETA == 1.0 else BETA * x
    sp = jnp.log1p(jnp.exp(jnp.minimum(bx, THRESHOLD)))
    if BETA != 1.0:
        sp = sp / BETA
    sp = jnp.where(bx > THRESHOLD, x, sp)
    if dim is None:
        return sp / jnp.sum(sp)
    return sp / jnp.sum(sp, axis=dim, keepdims=True)


if __name__ == "__main__":
    key = jax.random.PRNGKey(0)
    B, C, H, W = 2, 4, 16, 32
    x = jax.random.normal(key, (B, C, H, W), dtype=jnp.float32) * 3.0
    # Deterministically exercise both softplus branches (identity and log1p regions).
    x = x.at[0, 0, 0, 0].set(30.0).at[0, 0, 0, 1].set(-30.0)

    # dim = -1: lane-axis normalization (byte-budget row tiles, 8-step grid here).
    y = softplusmax(x, dim=-1)
    jax.block_until_ready(y)
    assert y.shape == x.shape
    assert jnp.allclose(y, _reference(x, -1), atol=1e-5, rtol=1e-5)
    assert jnp.allclose(jnp.sum(y, axis=-1), 1.0, atol=1e-5)

    # dim = 1: non-last axis -> in-kernel sublane reduction, no HBM transpose.
    y1 = softplusmax(x, dim=1)
    jax.block_until_ready(y1)
    assert y1.shape == x.shape
    assert jnp.allclose(y1, _reference(x, 1), atol=1e-5, rtol=1e-5)
    assert jnp.allclose(jnp.sum(y1, axis=1), 1.0, atol=1e-5)

    # dim = None (PyTorch default): global normalization via tiled two-pass.
    yn = softplusmax(x, dim=None)
    jax.block_until_ready(yn)
    assert yn.shape == x.shape
    assert jnp.allclose(yn, _reference(x, None), atol=1e-5, rtol=1e-5)
    assert jnp.allclose(jnp.sum(yn), 1.0, atol=1e-4)

    print("KERNEL_OK")
</pallas_src>

<mosaic_0001>
module attributes {stable_mosaic.version = 11 : i64} {
  func.func @_lane_kernel(%arg0: i32, %arg1: memref<16x32xf32, #tpu.memory_space<vmem>>, %arg2: memref<16x32xf32, #tpu.memory_space<vmem>>) attributes {dimension_semantics = [#tpu.dimension_semantics<parallel>], iteration_bounds = array<i64: 8>, scalar_prefetch = 0 : i64, scratch_operands = 0 : i64, tpu.core_type = #tpu.core_type<tc>, window_params = [{transform_indices = @transform_0, window_bounds = array<i64: 16, 32>}, {transform_indices = @transform_1, window_bounds = array<i64: 16, 32>}]} {
    %c0 = arith.constant 0 : index
    %c0_0 = arith.constant 0 : index
    %0 = vector.load %arg1[%c0, %c0_0] : memref<16x32xf32, #tpu.memory_space<vmem>>, vector<16x32xf32>
    %cst = arith.constant 2.000000e+01 : f32
    %1 = vector.broadcast %cst : f32 to vector<16x32xf32>
    %2 = arith.minimumf %0, %1 : vector<16x32xf32>
    %3 = math.exp %2 : vector<16x32xf32>
    %4 = math.log1p %3 : vector<16x32xf32>
    %cst_1 = arith.constant 2.000000e+01 : f32
    %5 = vector.broadcast %cst_1 : f32 to vector<16x32xf32>
    %6 = arith.cmpf ogt, %0, %5 : vector<16x32xf32>
    %7 = arith.select %6, %0, %4 : vector<16x32xi1>, vector<16x32xf32>
    %cst_2 = arith.constant dense<0.000000e+00> : vector<16xf32>
    %8 = vector.multi_reduction <add>, %7, %cst_2 [1] : vector<16x32xf32> to vector<16xf32>
    %9 = vector.shape_cast %8 : vector<16xf32> to vector<16x1xf32>
    %cst_3 = arith.constant 1.000000e+00 : f32
    %10 = vector.broadcast %cst_3 : f32 to vector<16x1xf32>
    %11 = arith.divf %10, %9 : vector<16x1xf32>
    %12 = vector.broadcast %11 : vector<16x1xf32> to vector<16x32xf32>
    %13 = arith.mulf %7, %12 : vector<16x32xf32>
    %c0_4 = arith.constant 0 : index
    %c0_5 = arith.constant 0 : index
    %14 = vector.load %arg2[%c0_4, %c0_5] : memref<16x32xf32, #tpu.memory_space<vmem>>, vector<16x32xf32>
    tpu.vector_store %arg2[%c0_4, %c0_5], %13 {strides = array<i32>} : memref<16x32xf32, #tpu.memory_space<vmem>>, vector<16x32xf32>,
    return
  }
  func.func @transform_0(%arg0: i32) -> (i32, i32) {
    %c0_i32 = arith.constant 0 : i32
    %c0_i32_0 = arith.constant 0 : i32
    return %arg0, %c0_i32 : i32, i32
  }
  func.func @transform_1(%arg0: i32) -> (i32, i32) {
    %c0_i32 = arith.constant 0 : i32
    %c0_i32_0 = arith.constant 0 : i32
    return %arg0, %c0_i32 : i32, i32
  }
}

</mosaic_0001>

<bundles_post_ra>
// kernel: tpu_custom_call.1
= control target key start
LH: loop header
LB: loop body
LE: loop exit
PB: predicated region body
PF: predicated region fallthrough
CT: control target
= control target key end

     0   :  { %s296_s6 = smov 0   ;;  %s324_s0 = inlined_call_operand.vmem [shape: f32[128,32], index: 0, kind: input, shape index: {}]   ;;  %s325_s1 = inlined_call_operand.vmem [shape: f32[128,32], index: 1, kind: output, shape index: {}]  }
   0x1 LB: > { %s247_s7 = sadd.s32 4294967295, %s284_s6   ;;  %p251_p0 = scmp.ge.s32.totalorder %s284_s6, 1  ;;  %s284_s6 = sphi %s296_s6, %s11_s6  }
   0x2   : > { %p88_p1 = scmp.lt.s32.totalorder %s284_s6, 9 }
   0x4   : > { %p89_p2 = pnand %p251_p0, %p88_p1 }
   0x5   : > { %s252_s8 = sshll.u32 (!%p89_p2), %s247_s7, 1 }
   0x6   : > { %92 = sbr.rel (%p89_p2) target bundleno = 184 (0xb8), region = 24  ;;  %p109_p3 = scmp.lt.s32.totalorder (!%p89_p2), %s252_s8, 15 }
   0xb   : > { %s327_s8 = smov (!%p109_p3, %s252_s8), 15  ;;  %vm150_vm2 = vcmask 261120  }
   0xc   : > { %s253_s9 = sshll.u32 %s327_s8, 3 }
   0xd   : > { %s112_s12 = scalar_lea.vmem %s324_s0, %s253_s9  ;;  %s118_s15 = scalar_lea.vmem %s325_s1, %s253_s9 }
   0xe   : > { %v120_v0 = vld [vmem:[%s112_s12] sm:$0xff]  ;;  %v121_v1 = vld [vmem:[%s112_s12 + $0x8] sm:$0xff] }
   0xf   : > { %v122_v2 = vmin.f32 %v120_v0, 20.0  ;;  %v123_v3 = vmin.f32 %v121_v1, 20.0  ;;  %vm146_vm1 = vcmp.gt.f32.partialorder %v120_v0, 20.0  ;;  %vm147_vm4 = vcmp.gt.f32.partialorder %v121_v1, 20.0 }
  0x11   : > { %v124_v4 = vmul.f32 1.442695, %v122_v2  ;;  %v126_v5 = vmul.f32 1.442695, %v123_v3 }
  0x13   : > { %266 = vpow2.f32 %v124_v4 }
  0x14   : > { %268 = vpow2.f32 %v126_v5 }
  0x19   : > { %v267_v6 = vpop.eup %266 }
  0x1a   : > { %v269_v7 = vpop.eup %268  ;;  %v128_v8 = vadd.f32 1.0, %v267_v6  ;;  %v131_v9 = vmul.f32 -0.5, %v267_v6  ;;  %v134_v13 = vand.u32 2147483647, %v267_v6 }
  0x1b   : > { %v137_v10 = vadd.f32 1.0, %v269_v7  ;;  %v140_v11 = vmul.f32 -0.5, %v269_v7  ;;  %v143_v15 = vand.u32 2147483647, %v269_v7 }
  0x1c   : > { %270 = vlog2.f32 %v128_v8  ;;  %v132_v12 = vadd.f32 1.0, %v131_v9  ;;  %vm135_vm0 = vcmp.lt.f32.partialorder %v134_v13, 0.0004427343 }
  0x1d   : > { %272 = vlog2.f32 %v137_v10  ;;  %v141_v14 = vadd.f32 1.0, %v140_v11  ;;  %vm144_vm3 = vcmp.lt.f32.partialorder %v143_v15, 0.0004427343 }
  0x1e   : > { %v133_v16 = vmul.f32 %v267_v6, %v132_v12 }
  0x1f   : > { %v142_v20 = vmul.f32 %v269_v7, %v141_v14 }
  0x22   : > { %v271_v17 = vpop.eup %270 }
  0x23   : > { %v273_v18 = vpop.eup %272  ;;  %v130_v19 = vmul.f32 0.6931472, %v271_v17 }
  0x24   : > { %v139_v21 = vmul.f32 0.6931472, %v273_v18 }
  0x25   : > { %v136_v22 = vsel %vm135_vm0, %v133_v16, %v130_v19 }
  0x26   : > { %v148_v23 = vsel %vm146_vm1, %v120_v0, %v136_v22  ;;  %v145_v25 = vsel %vm144_vm3, %v142_v20, %v139_v21 }
  0x27   : > { %v151_v24 = vsel %vm150_vm2, %v148_v23, 0.0  ;;  %v149_v26 = vsel %vm147_vm4, %v121_v1, %v145_v25 }
  0x28   : > { %152 = vadd.xlane.f32.xlu0 %v151_v24  ;;  %v154_v27 = vsel %vm150_vm2, %v149_v26, 0.0 }
  0x30   : > { %155 = vadd.xlane.f32.xlu0 %v154_v27 }
  0x9b   : > { %v153_v28 = vpop.xlane.xlu0 %152 }
  0x9c   : > { %274 = vrcp.f32 %v153_v28  ;;  %v168_v33 = vand.u32 2147483648, %v153_v28  ;;  %v166_v35 = vand.u32 2147483647, %v153_v28  ;;  %vm162_vm6 = vweird.f32 %v153_v28 }
  0x9e   : > { %v169_v38 = vor.u32 1.1754944e-38, %v168_v33  ;;  %vm167_vm8 = vcmp.eq.f32.partialorder %v166_v35, 8.507059e+37 }
  0xa2   : > { %v275_v29 = vpop.eup %274 }
  0xa3   : > { %v158_v30 = vmul.f32 %v275_v29, %v153_v28  ;;  %v156_v31 = vpop.xlane.xlu0 %155  ;;  %vm163_vm5 = vweird.f32 %v275_v29 }
  0xa4   : > { %276 = vrcp.f32 %v156_v31  ;;  %vm164_vm7 = vmor %vm162_vm6, %vm163_vm5  ;;  %v183_v44 = vand.u32 2147483648, %v156_v31  ;;  %v181_v46 = vand.u32 2147483647, %v156_v31  ;;  %vm177_vm10 = vweird.f32 %v156_v31 }
  0xa5   : > { %v159_v32 = vsub.f32 1.0, %v158_v30 }
  0xa6   : > { %v184_v48 = vor.u32 1.1754944e-38, %v183_v44  ;;  %vm182_vm12 = vcmp.eq.f32.partialorder %v181_v46, 8.507059e+37 }
  0xa7   : > { %v160_v34 = vmul.f32 %v275_v29, %v159_v32 }
  0xa9   : > { %v161_v36 = vadd.f32 %v275_v29, %v160_v34 }
  0xaa   : > { %v277_v37 = vpop.eup %276 }
  0xab   : > { %v165_v39 = vsel %vm164_vm7, %v275_v29, %v161_v36  ;;  %v173_v40 = vmul.f32 %v277_v37, %v156_v31  ;;  %vm178_vm9 = vweird.f32 %v277_v37 }
  0xac   : > { %v170_v41 = vsel %vm167_vm8, %v169_v38, %v165_v39  ;;  %vm179_vm11 = vmor %vm177_vm10, %vm178_vm9 }
  0xad   : > { %v187_v42 = vmul.f32 %v170_v41, %v148_v23  ;;  %v174_v43 = vsub.f32 1.0, %v173_v40 }
  0xaf   : > { %189 = vst.msk [vmem:[%s118_s15] sm:$0xff] %vm150_vm2, %v187_v42  ;;  %v175_v45 = vmul.f32 %v277_v37, %v174_v43 }
  0xb1   : > { %v176_v47 = vadd.f32 %v277_v37, %v175_v45 }
  0xb3   : > { %v180_v49 = vsel %vm179_vm11, %v277_v37, %v176_v47 }
  0xb4   : > { %v185_v50 = vsel %vm182_vm12, %v184_v48, %v180_v49 }
  0xb5   : > { %v188_v51 = vmul.f32 %v185_v50, %v149_v26 }
  0xb7   : > { %190 = vst.msk [vmem:[%s118_s15 + $0x8] sm:$0xff] %vm150_vm2, %v188_v51 }
  0xb8 PF: > { %s11_s6 = sadd.s32 1, %s284_s6  }
  0xb9   : > { %p8_p4 = scmp.ge.s32.totalorder %s11_s6, 10  }
  0xbb   :  { %10 = sbr.rel (!%p8_p4) target bundleno = 1 (0x1), region = 54 }

</bundles_post_ra>
